<compile_context>
chip_gen: v7x
topology: tpu7x:2x2x1
jax: 0.10.0
libtpu: 0.0.40
codegen_flags: <defaults>
</compile_context>

<pallas_src>
import functools

import jax
import jax.numpy as jnp
from jax.experimental import pallas as pl
from jax.experimental.pallas import tpu as pltpu

LANE = 128        # pad hidden feature dims to the TPU lane width
OUT_PAD = 8       # pad only the final output dim to 8 (narrow, lane-legal store)


def _round_up(n, m):
    return ((n + m - 1) // m) * m


def _choose_tb(batch):
    """Adaptive batch tile: small batches -> one tile; larger batches -> >=2
    grid steps (so v7x's two TensorCores both get work), capped at 1024 rows."""
    b16 = _round_up(batch, 16)
    if b16 <= 256:
        return b16
    return min(1024, _round_up((b16 + 1) // 2, 16))


def _mlp_kernel(x_ref,
                w1_ref, b1_ref,
                w2_ref, b2_ref,
                w3_ref, b3_ref,
                w4_ref, b4_ref,
                w5_ref, b5_ref,
                o_ref):
    """One batch tile of the fused 5-layer MLP.

    x_ref: (tb, n_in) f32, cast to bf16 here.  w*: bf16, resident in VMEM
    across grid steps (constant index maps).  b*: (1, out) f32.  Matmuls
    accumulate in f32 on the MXU; bias + ReLU in f32; re-cast to bf16 between
    layers.  Final layer: no ReLU, (tb, OUT_PAD) f32 store.
    """
    h = x_ref[...].astype(jnp.bfloat16)
    for w_ref, b_ref in ((w1_ref, b1_ref), (w2_ref, b2_ref),
                         (w3_ref, b3_ref), (w4_ref, b4_ref)):
        acc = jnp.dot(h, w_ref[...], preferred_element_type=jnp.float32)
        h = jnp.maximum(acc + b_ref[...], 0.0).astype(jnp.bfloat16)
    acc = jnp.dot(h, w5_ref[...], preferred_element_type=jnp.float32)
    o_ref[...] = acc + b5_ref[...]


def prepare_params(params):
    """One-time padding/casting of parameters (outside the per-call path).

    Layer i weight (fi, fo) -> bf16 (fi_p, fo_p), bias -> f32 (1, fo_p), with
      * layer 0's input dim kept at n_in (x is passed unpadded; n_in=32 here is
        already a bf16 sublane multiple),
      * hidden dims zero-padded to 128 lanes,
      * the last layer's output dim padded only to OUT_PAD (=8).
    Padded rows/cols and padded bias entries are exactly zero, so padding is
    exact through matmul + ReLU.  Returns (flat_params_tuple, n_out).
    """
    n_layers = len(params)
    flat = []
    for i, (w, b) in enumerate(params):
        fi, fo = int(w.shape[0]), int(w.shape[1])
        fip = fi if i == 0 else _round_up(fi, LANE)
        fop = _round_up(fo, OUT_PAD) if i == n_layers - 1 else _round_up(fo, LANE)
        wp = jnp.zeros((fip, fop), jnp.bfloat16).at[:fi, :fo].set(
            w.astype(jnp.bfloat16))
        bp = jnp.zeros((1, fop), jnp.float32).at[:, :fo].set(
            jnp.asarray(b, jnp.float32).reshape(1, fo))
        flat += [wp, bp]
    return tuple(flat), int(params[-1][0].shape[1])


@functools.partial(jax.jit, static_argnames=("tb", "n_out"))
def _dqn_forward_padded(x, flat_params, *, tb, n_out):
    batch, n_in = x.shape
    assert flat_params[0].shape[0] == n_in, "x feature dim != first-layer fan-in"
    b_pad = _round_up(batch, tb)

    # Batch-pad only when needed (the demo shapes hit the no-copy fast path).
    xp = x if b_pad == batch else (
        jnp.zeros((b_pad, n_in), x.dtype).at[:batch].set(x))

    # x / out are tiled over the batch grid; every weight/bias BlockSpec
    # returns (0, 0) so parameters are DMA'd once and stay resident in VMEM.
    in_specs = [pl.BlockSpec((tb, n_in), lambda i: (i, 0))]
    in_specs += [pl.BlockSpec(p.shape, lambda i: (0, 0)) for p in flat_params]

    n_out_pad = flat_params[-2].shape[1]       # W5's padded output dim (= 8)
    out_shape = jax.ShapeDtypeStruct((b_pad, n_out_pad), jnp.float32)

    flops = sum(2 * b_pad * w.shape[0] * w.shape[1] for w in flat_params[0::2])
    bytes_accessed = (
        xp.size * xp.dtype.itemsize
        + sum(p.size * p.dtype.itemsize for p in flat_params)
        + b_pad * n_out_pad * 4)

    out = pl.pallas_call(
        _mlp_kernel,
        out_shape=out_shape,
        grid=(b_pad // tb,),
        in_specs=in_specs,
        out_specs=pl.BlockSpec((tb, n_out_pad), lambda i: (i, 0)),
        compiler_params=pltpu.CompilerParams(
            dimension_semantics=("parallel",)),
        cost_estimate=pl.CostEstimate(
            flops=int(flops), transcendentals=0,
            bytes_accessed=int(bytes_accessed)),
    )(xp, *flat_params)

    return out[:batch, :n_out]


def dqn_forward(x, prepared):
    """Forward pass.  `prepared` is the result of prepare_params(params)."""
    flat_params, n_out = prepared
    tb = _choose_tb(x.shape[0])
    return _dqn_forward_padded(x, flat_params, tb=tb, n_out=n_out)


def init_params(key, n_in):
    """Deterministic synthetic init (uniform +-1/sqrt(fan_in), like torch Linear)."""
    dims = [n_in, 100, 70, 40, 10, 1]
    params = []
    for fan_in, fan_out in zip(dims[:-1], dims[1:]):
        key, kw, kb = jax.random.split(key, 3)
        bound = 1.0 / jnp.sqrt(jnp.float32(fan_in))
        w = jax.random.uniform(kw, (fan_in, fan_out), jnp.float32, -bound, bound)
        b = jax.random.uniform(kb, (1, fan_out), jnp.float32, -bound, bound)
        params.append((w, b))
    return params


def reference_forward(x, params, mimic_bf16=False):
    """Pure-JAX reference.  mimic_bf16=True reproduces the kernel's bf16-in /
    f32-accumulate numerics; False is the exact f32 PyTorch semantics."""
    h = x.astype(jnp.bfloat16) if mimic_bf16 else x
    n = len(params)
    for i, (w, b) in enumerate(params):
        if mimic_bf16:
            w = w.astype(jnp.bfloat16)
        acc = jnp.dot(h, w, preferred_element_type=jnp.float32) + b.reshape(1, -1)
        if i < n - 1:
            acc = jnp.maximum(acc, 0.0)
            h = acc.astype(jnp.bfloat16) if mimic_bf16 else acc
        else:
            h = acc
    return h


# TODO(synk): only the forward pass is implemented in Pallas; replay buffer,
# SGD optimizer and trainstep/loss from the PyTorch class are host-side
# training machinery with no kernel equivalent here.

if __name__ == "__main__":
    key = jax.random.PRNGKey(0)
    key, kx = jax.random.split(key)

    # Replay-batch sized input (B=512, tb=256 -> 2 parallel grid steps).
    B, n_in = 512, 32
    x = jax.random.normal(kx, (B, n_in), jnp.float32)
    params = init_params(key, n_in)
    prepared = prepare_params(params)       # one-time pad/cast, outside jit

    out = jax.block_until_ready(dqn_forward(x, prepared))
    assert out.shape == (B, 1), out.shape

    # Tight check against a reference with matching bf16/f32 numerics.
    ref_bf16 = reference_forward(x, params, mimic_bf16=True)
    assert jnp.allclose(out, ref_bf16, atol=1e-3, rtol=1e-3), (
        float(jnp.max(jnp.abs(out - ref_bf16))))

    # Loose sanity check against the exact f32 PyTorch semantics.
    ref_f32 = reference_forward(x, params, mimic_bf16=False)
    assert jnp.allclose(out, ref_f32, atol=1e-1, rtol=1e-1), (
        float(jnp.max(jnp.abs(out - ref_f32))))

    print("KERNEL_OK")
</pallas_src>

<mosaic_0001>
module attributes {stable_mosaic.version = 11 : i64} {
  func.func @_mlp_kernel(%arg0: i32, %arg1: memref<256x32xf32, #tpu.memory_space<vmem>>, %arg2: memref<32x128xbf16, #tpu.memory_space<vmem>>, %arg3: memref<1x128xf32, #tpu.memory_space<vmem>>, %arg4: memref<128x128xbf16, #tpu.memory_space<vmem>>, %arg5: memref<1x128xf32, #tpu.memory_space<vmem>>, %arg6: memref<128x128xbf16, #tpu.memory_space<vmem>>, %arg7: memref<1x128xf32, #tpu.memory_space<vmem>>, %arg8: memref<128x128xbf16, #tpu.memory_space<vmem>>, %arg9: memref<1x128xf32, #tpu.memory_space<vmem>>, %arg10: memref<128x8xbf16, #tpu.memory_space<vmem>>, %arg11: memref<1x8xf32, #tpu.memory_space<vmem>>, %arg12: memref<256x8xf32, #tpu.memory_space<vmem>>) attributes {dimension_semantics = [#tpu.dimension_semantics<parallel>], iteration_bounds = array<i64: 2>, scalar_prefetch = 0 : i64, scratch_operands = 0 : i64, tpu.core_type = #tpu.core_type<tc>, window_params = [{transform_indices = @transform_0, window_bounds = array<i64: 256, 32>}, {pipeline_mode = #tpu.pipeline_mode<synchronous>, transform_indices = @transform_1, window_bounds = array<i64: 32, 128>}, {pipeline_mode = #tpu.pipeline_mode<synchronous>, transform_indices = @transform_2, window_bounds = array<i64: 1, 128>}, {pipeline_mode = #tpu.pipeline_mode<synchronous>, transform_indices = @transform_3, window_bounds = array<i64: 128, 128>}, {pipeline_mode = #tpu.pipeline_mode<synchronous>, transform_indices = @transform_4, window_bounds = array<i64: 1, 128>}, {pipeline_mode = #tpu.pipeline_mode<synchronous>, transform_indices = @transform_5, window_bounds = array<i64: 128, 128>}, {pipeline_mode = #tpu.pipeline_mode<synchronous>, transform_indices = @transform_6, window_bounds = array<i64: 1, 128>}, {pipeline_mode = #tpu.pipeline_mode<synchronous>, transform_indices = @transform_7, window_bounds = array<i64: 128, 128>}, {pipeline_mode = #tpu.pipeline_mode<synchronous>, transform_indices = @transform_8, window_bounds = array<i64: 1, 128>}, {pipeline_mode = #tpu.pipeline_mode<synchronous>, transform_indices = @transform_9, window_bounds = array<i64: 128, 8>}, {pipeline_mode = #tpu.pipeline_mode<synchronous>, transform_indices = @transform_10, window_bounds = array<i64: 1, 8>}, {transform_indices = @transform_11, window_bounds = array<i64: 256, 8>}]} {
    %c0 = arith.constant 0 : index
    %c0_0 = arith.constant 0 : index
    %0 = vector.load %arg1[%c0, %c0_0] : memref<256x32xf32, #tpu.memory_space<vmem>>, vector<256x32xf32>
    %1 = arith.truncf %0 : vector<256x32xf32> to vector<256x32xbf16>
    %c0_1 = arith.constant 0 : index
    %c0_2 = arith.constant 0 : index
    %2 = vector.load %arg2[%c0_1, %c0_2] : memref<32x128xbf16, #tpu.memory_space<vmem>>, vector<32x128xbf16>
    %cst = arith.constant dense<0.000000e+00> : vector<256x128xf32>
    %3 = tpu.matmul %1, %2, %cst {dimension_numbers = #tpu.dot_dimension_numbers<[1], [0], [0], [1], [0, 0, 1, 1], [], []>} : vector<256x32xbf16>, vector<32x128xbf16>, vector<256x128xf32> -> vector<256x128xf32>
    %c0_3 = arith.constant 0 : index
    %c0_4 = arith.constant 0 : index
    %4 = vector.load %arg3[%c0_3, %c0_4] : memref<1x128xf32, #tpu.memory_space<vmem>>, vector<1x128xf32>
    %5 = vector.broadcast %4 : vector<1x128xf32> to vector<256x128xf32>
    %6 = arith.addf %3, %5 : vector<256x128xf32>
    %cst_5 = arith.constant 0.000000e+00 : f32
    %7 = vector.broadcast %cst_5 : f32 to vector<256x128xf32>
    %8 = arith.maximumf %6, %7 : vector<256x128xf32>
    %9 = arith.truncf %8 : vector<256x128xf32> to vector<256x128xbf16>
    %c0_6 = arith.constant 0 : index
    %c0_7 = arith.constant 0 : index
    %10 = vector.load %arg4[%c0_6, %c0_7] : memref<128x128xbf16, #tpu.memory_space<vmem>>, vector<128x128xbf16>
    %cst_8 = arith.constant dense<0.000000e+00> : vector<256x128xf32>
    %11 = tpu.matmul %9, %10, %cst_8 {dimension_numbers = #tpu.dot_dimension_numbers<[1], [0], [0], [1], [0, 0, 1, 1], [], []>} : vector<256x128xbf16>, vector<128x128xbf16>, vector<256x128xf32> -> vector<256x128xf32>
    %c0_9 = arith.constant 0 : index
    %c0_10 = arith.constant 0 : index
    %12 = vector.load %arg5[%c0_9, %c0_10] : memref<1x128xf32, #tpu.memory_space<vmem>>, vector<1x128xf32>
    %13 = vector.broadcast %12 : vector<1x128xf32> to vector<256x128xf32>
    %14 = arith.addf %11, %13 : vector<256x128xf32>
    %cst_11 = arith.constant 0.000000e+00 : f32
    %15 = vector.broadcast %cst_11 : f32 to vector<256x128xf32>
    %16 = arith.maximumf %14, %15 : vector<256x128xf32>
    %17 = arith.truncf %16 : vector<256x128xf32> to vector<256x128xbf16>
    %c0_12 = arith.constant 0 : index
    %c0_13 = arith.constant 0 : index
    %18 = vector.load %arg6[%c0_12, %c0_13] : memref<128x128xbf16, #tpu.memory_space<vmem>>, vector<128x128xbf16>
    %cst_14 = arith.constant dense<0.000000e+00> : vector<256x128xf32>
    %19 = tpu.matmul %17, %18, %cst_14 {dimension_numbers = #tpu.dot_dimension_numbers<[1], [0], [0], [1], [0, 0, 1, 1], [], []>} : vector<256x128xbf16>, vector<128x128xbf16>, vector<256x128xf32> -> vector<256x128xf32>
    %c0_15 = arith.constant 0 : index
    %c0_16 = arith.constant 0 : index
    %20 = vector.load %arg7[%c0_15, %c0_16] : memref<1x128xf32, #tpu.memory_space<vmem>>, vector<1x128xf32>
    %21 = vector.broadcast %20 : vector<1x128xf32> to vector<256x128xf32>
    %22 = arith.addf %19, %21 : vector<256x128xf32>
    %cst_17 = arith.constant 0.000000e+00 : f32
    %23 = vector.broadcast %cst_17 : f32 to vector<256x128xf32>
    %24 = arith.maximumf %22, %23 : vector<256x128xf32>
    %25 = arith.truncf %24 : vector<256x128xf32> to vector<256x128xbf16>
    %c0_18 = arith.constant 0 : index
    %c0_19 = arith.constant 0 : index
    %26 = vector.load %arg8[%c0_18, %c0_19] : memref<128x128xbf16, #tpu.memory_space<vmem>>, vector<128x128xbf16>
    %cst_20 = arith.constant dense<0.000000e+00> : vector<256x128xf32>
    %27 = tpu.matmul %25, %26, %cst_20 {dimension_numbers = #tpu.dot_dimension_numbers<[1], [0], [0], [1], [0, 0, 1, 1], [], []>} : vector<256x128xbf16>, vector<128x128xbf16>, vector<256x128xf32> -> vector<256x128xf32>
    %c0_21 = arith.constant 0 : index
    %c0_22 = arith.constant 0 : index
    %28 = vector.load %arg9[%c0_21, %c0_22] : memref<1x128xf32, #tpu.memory_space<vmem>>, vector<1x128xf32>
    %29 = vector.broadcast %28 : vector<1x128xf32> to vector<256x128xf32>
    %30 = arith.addf %27, %29 : vector<256x128xf32>
    %cst_23 = arith.constant 0.000000e+00 : f32
    %31 = vector.broadcast %cst_23 : f32 to vector<256x128xf32>
    %32 = arith.maximumf %30, %31 : vector<256x128xf32>
    %33 = arith.truncf %32 : vector<256x128xf32> to vector<256x128xbf16>
    %c0_24 = arith.constant 0 : index
    %c0_25 = arith.constant 0 : index
    %34 = vector.load %arg10[%c0_24, %c0_25] : memref<128x8xbf16, #tpu.memory_space<vmem>>, vector<128x8xbf16>
    %cst_26 = arith.constant dense<0.000000e+00> : vector<256x8xf32>
    %35 = tpu.matmul %33, %34, %cst_26 {dimension_numbers = #tpu.dot_dimension_numbers<[1], [0], [0], [1], [0, 0, 1, 1], [], []>} : vector<256x128xbf16>, vector<128x8xbf16>, vector<256x8xf32> -> vector<256x8xf32>
    %c0_27 = arith.constant 0 : index
    %c0_28 = arith.constant 0 : index
    %36 = vector.load %arg11[%c0_27, %c0_28] : memref<1x8xf32, #tpu.memory_space<vmem>>, vector<1x8xf32>
    %37 = vector.broadcast %36 : vector<1x8xf32> to vector<256x8xf32>
    %38 = arith.addf %35, %37 : vector<256x8xf32>
    %c0_29 = arith.constant 0 : index
    %c0_30 = arith.constant 0 : index
    %39 = vector.load %arg12[%c0_29, %c0_30] : memref<256x8xf32, #tpu.memory_space<vmem>>, vector<256x8xf32>
    tpu.vector_store %arg12[%c0_29, %c0_30], %38 {strides = array<i32>} : memref<256x8xf32, #tpu.memory_space<vmem>>, vector<256x8xf32>,
    return
  }
  func.func @transform_0(%arg0: i32) -> (i32, i32) {
    %c0_i32 = arith.constant 0 : i32
    %c0_i32_0 = arith.constant 0 : i32
    return %arg0, %c0_i32 : i32, i32
  }
  func.func @transform_1(%arg0: i32) -> (i32, i32) {
    %c0_i32 = arith.constant 0 : i32
    %c0_i32_0 = arith.constant 0 : i32
    %c0_i32_1 = arith.constant 0 : i32
    return %c0_i32, %c0_i32_0 : i32, i32
  }
  func.func @transform_2(%arg0: i32) -> (i32, i32) {
    %c0_i32 = arith.constant 0 : i32
    %c0_i32_0 = arith.constant 0 : i32
    %c0_i32_1 = arith.constant 0 : i32
    return %c0_i32, %c0_i32_0 : i32, i32
  }
  func.func @transform_3(%arg0: i32) -> (i32, i32) {
    %c0_i32 = arith.constant 0 : i32
    %c0_i32_0 = arith.constant 0 : i32
    %c0_i32_1 = arith.constant 0 : i32
    return %c0_i32, %c0_i32_0 : i32, i32
  }
  func.func @transform_4(%arg0: i32) -> (i32, i32) {
    %c0_i32 = arith.constant 0 : i32
    %c0_i32_0 = arith.constant 0 : i32
    %c0_i32_1 = arith.constant 0 : i32
    return %c0_i32, %c0_i32_0 : i32, i32
  }
  func.func @transform_5(%arg0: i32) -> (i32, i32) {
    %c0_i32 = arith.constant 0 : i32
    %c0_i32_0 = arith.constant 0 : i32
    %c0_i32_1 = arith.constant 0 : i32
    return %c0_i32, %c0_i32_0 : i32, i32
  }
  func.func @transform_6(%arg0: i32) -> (i32, i32) {
    %c0_i32 = arith.constant 0 : i32
    %c0_i32_0 = arith.constant 0 : i32
    %c0_i32_1 = arith.constant 0 : i32
    return %c0_i32, %c0_i32_0 : i32, i32
  }
  func.func @transform_7(%arg0: i32) -> (i32, i32) {
    %c0_i32 = arith.constant 0 : i32
    %c0_i32_0 = arith.constant 0 : i32
    %c0_i32_1 = arith.constant 0 : i32
    return %c0_i32, %c0_i32_0 : i32, i32
  }
  func.func @transform_8(%arg0: i32) -> (i32, i32) {
    %c0_i32 = arith.constant 0 : i32
    %c0_i32_0 = arith.constant 0 : i32
    %c0_i32_1 = arith.constant 0 : i32
    return %c0_i32, %c0_i32_0 : i32, i32
  }
  func.func @transform_9(%arg0: i32) -> (i32, i32) {
    %c0_i32 = arith.constant 0 : i32
    %c0_i32_0 = arith.constant 0 : i32
    %c0_i32_1 = arith.constant 0 : i32
    return %c0_i32, %c0_i32_0 : i32, i32
  }
  func.func @transform_10(%arg0: i32) -> (i32, i32) {
    %c0_i32 = arith.constant 0 : i32
    %c0_i32_0 = arith.constant 0 : i32
    %c0_i32_1 = arith.constant 0 : i32
    return %c0_i32, %c0_i32_0 : i32, i32
  }
  func.func @transform_11(%arg0: i32) -> (i32, i32) {
    %c0_i32 = arith.constant 0 : i32
    %c0_i32_0 = arith.constant 0 : i32
    return %arg0, %c0_i32 : i32, i32
  }
}

</mosaic_0001>

<bundles_post_ra>
// kernel: _dqn_forward_padded.1
= control target key start
LH: loop header
LB: loop body
LE: loop exit
PB: predicated region body
PF: predicated region fallthrough
CT: control target
= control target key end

     0   :  { %s2403_s17 = smov 0   ;;  %s2836_s0 = inlined_call_operand.vmem [shape: f32[512,32], index: 0, kind: input, shape index: {}]   ;;  %s2837_s1 = inlined_call_operand.vmem [shape: bf16[32,128], index: 1, kind: input, shape index: {}]   ;;  %s2838_s2 = inlined_call_operand.vmem [shape: f32[1,128], index: 2, kind: input, shape index: {}]   ;;  %s2839_s3 = inlined_call_operand.vmem [shape: bf16[128,128], index: 3, kind: input, shape index: {}]   ;;  %s2840_s4 = inlined_call_operand.vmem [shape: f32[1,128], index: 4, kind: input, shape index: {}]   ;;  %s2841_s5 = inlined_call_operand.vmem [shape: bf16[128,128], index: 5, kind: input, shape index: {}]   ;;  %s2842_s6 = inlined_call_operand.vmem [shape: f32[1,128], index: 6, kind: input, shape index: {}]   ;;  %s2843_s7 = inlined_call_operand.vmem [shape: bf16[128,128], index: 7, kind: input, shape index: {}]   ;;  %s2844_s8 = inlined_call_operand.vmem [shape: f32[1,128], index: 8, kind: input, shape index: {}]   ;;  %s2845_s9 = inlined_call_operand.vmem [shape: bf16[128,8], index: 9, kind: input, shape index: {}]   ;;  %s2846_s10 = inlined_call_operand.vmem [shape: f32[1,8], index: 10, kind: input, shape index: {}]   ;;  %s2847_s11 = inlined_call_operand.vmem [shape: f32[512,8], index: 11, kind: output, shape index: {}]  }
   0x1 LB: > { %s1881_s18 = sadd.s32 4294967295, %s2341_s17   ;;  %p1885_p0 = scmp.ge.s32.totalorder %s2341_s17, 1  ;;  %s2341_s17 = sphi %s2403_s17, %s21_s17  }
   0x2   : > { %p338_p1 = scmp.lt.s32.totalorder %s2341_s17, 3 }
   0x4   : > { %p339_p2 = pnand %p1885_p0, %p338_p1 }
   0x5   : > { %v2301_v0 = vld [vmem:[%s2837_s1] sm:$0xff] (!%p339_p2)   ;;  %s1886_s21 = sshll.u32 (!%p339_p2), %s1881_s18, 5  ;;  %v2302_v1 = vld [vmem:[%s2837_s1 + $0x8] sm:$0xff] (!%p339_p2)   ;;  %vm462_vm0 = vcmask (!%p339_p2), 261120   ;;  %v2305_v29 = vld [vmem:[%s2839_s3 + $0x10] sm:$0xff] (!%p339_p2)   ;;  %vm1792_vm1 = vcmask (!%p339_p2), 64512  }
   0x6   : > { %342 = sbr.rel (%p339_p2) target bundleno = 1182 (0x49e), region = 64  ;;  %p379_p3 = scmp.lt.s32.totalorder (!%p339_p2), %s1886_s21, 63  ;;  %2061 = vmatprep.subr.bf16.mxu0 (!%p339_p2), %v2301_v0  ;;  %2289 = vmatprep.subr.bf16.mxu1 (!%p339_p2), %v2301_v0  ;;  %v2303_v2 = vld [vmem:[%s2839_s3] sm:$0xff] (!%p339_p2)   ;;  %v2304_v24 = vld [vmem:[%s2839_s3 + $0x8] sm:$0xff] (!%p339_p2)   ;;  %v2306_v38 = vld [vmem:[%s2839_s3 + $0x18] sm:$0xff] (!%p339_p2)  }
   0x7   : > { %2062 = vmatpush3.bf16.msra.mxu0 (!%p339_p2), %v2301_v0  ;;  %2291 = vmatpush3.bf16.msra.mxu1 (!%p339_p2), %v2301_v0  ;;  %v2307_v46 = vld [vmem:[%s2839_s3 + $0x20] sm:$0xff] (!%p339_p2)   ;;  %v2308_v50 = vld [vmem:[%s2839_s3 + $0x28] sm:$0xff] (!%p339_p2)   ;;  %v2309_v56 = vld [vmem:[%s2839_s3 + $0x30] sm:$0xff] (!%p339_p2)  }
   0x8   : > { %2063 = vmatprep.subr.bf16.mxu0 (!%p339_p2), %v2302_v1  ;;  %2290 = vmatprep.subr.bf16.mxu1 (!%p339_p2), %v2302_v1  ;;  %v2310_v57 = vld [vmem:[%s2839_s3 + $0x38] sm:$0xff] (!%p339_p2)   ;;  %v2311_v58 = vld [vmem:[%s2841_s5] sm:$0xff] (!%p339_p2)   ;;  %v2312_v59 = vld [vmem:[%s2841_s5 + $0x8] sm:$0xff] (!%p339_p2)  }
   0x9   : > { %v2313_v60 = vld [vmem:[%s2841_s5 + $0x10] sm:$0xff] (!%p339_p2)   ;;  %v2314_v61 = vld [vmem:[%s2841_s5 + $0x18] sm:$0xff] (!%p339_p2)   ;;  %v2315_v62 = vld [vmem:[%s2841_s5 + $0x20] sm:$0xff] (!%p339_p2)  }
   0xa   : > { %v2316_v63 = vld [vmem:[%s2841_s5 + $0x28] sm:$0xff] (!%p339_p2)   ;;  %v2520_v0 = vld [vmem:[%s2838_s2] ss:$0 sm:$0xff] (!%p339_p2) }
   0xb   : > { %2064 = vmatpush3.bf16.msra.mxu0 (!%p339_p2), %v2302_v1  ;;  %2292 = vmatpush3.bf16.msra.mxu1 (!%p339_p2), %v2302_v1 }
   0xc   : > { %2097 = vmatprep.subr.bf16.mxu1 (!%p339_p2), %v2303_v2  ;;  %2145 = vmatprep.subr.bf16.mxu0 (!%p339_p2), %v2311_v58 }
   0xd   : > { %s2849_s21 = smov (!%p379_p3, %s1886_s21), 63 }
   0xe   : > { %s1887_s26 = sshll.u32 %s2849_s21, 3 }
   0xf   : > { %s2428_s29 = scalar_lea.vmem %s2836_s0, %s1887_s26  ;;  %s2735_s23 = scalar_lea.vmem %s2847_s11, %s1887_s26 }
  0x10   : > { %v391_v3 = vld [vmem:[%s2428_s29] sm:$0xff]  ;;  %v392_v4 = vld [vmem:[%s2428_s29 + $0x8] sm:$0xff]  ;;  %v393_v5 = vld [vmem:[%s2428_s29 + $0x10] sm:$0xff] }
  0x11   : > { %v423_v6 = vpack.c.bf16 %v392_v4, %v391_v3  ;;  %v394_v7 = vld [vmem:[%s2428_s29 + $0x18] sm:$0xff]  ;;  %v395_v8 = vld [vmem:[%s2428_s29 + $0x20] sm:$0xff]  ;;  %v396_v9 = vld [vmem:[%s2428_s29 + $0x28] sm:$0xff] }
  0x12   : > { %v424_v10 = vpack.c.bf16 %v394_v7, %v393_v5  ;;  %v425_v11 = vpack.c.bf16 %v396_v9, %v395_v8  ;;  %v397_v12 = vld [vmem:[%s2428_s29 + $0x30] sm:$0xff]  ;;  %v398_v13 = vld [vmem:[%s2428_s29 + $0x38] sm:$0xff]  ;;  %v399_v14 = vld [vmem:[%s2428_s29 + $0x40] sm:$0xff] }
  0x13   : > { %2065 = vmatprep.mubr.msk.bf16.mxu0 %vm462_vm0, %v423_v6  ;;  %v400_v15 = vld [vmem:[%s2428_s29 + $0x48] sm:$0xff]  ;;  %v407_v16 = vld [vmem:[%s2428_s29 + $0x80] sm:$0xff]  ;;  %v409_v19 = vld [vmem:[%s2428_s29 + $0x90] sm:$0xff]  ;;  %v426_v25 = vpack.c.bf16 %v398_v13, %v397_v12 }
  0x14   : > { %2066 = vmatmul.mubr.msk.bf16.vlgmr.msra.gmra.mrb[0].mxu0 %vm462_vm0, %v424_v10  ;;  %v408_v17 = vld [vmem:[%s2428_s29 + $0x88] sm:$0xff]  ;;  %v410_v20 = vld [vmem:[%s2428_s29 + $0x98] sm:$0xff]  ;;  %v411_v21 = vld [vmem:[%s2428_s29 + $0xa0] sm:$0xff]  ;;  %v427_v27 = vpack.c.bf16 %v400_v15, %v399_v14 }
  0x15   : > { %2069 = vmatprep.mubr.msk.bf16.mxu0 %vm462_vm0, %v425_v11  ;;  %v431_v18 = vpack.c.bf16 %v408_v17, %v407_v16  ;;  %v432_v22 = vpack.c.bf16 %v410_v20, %v409_v19  ;;  %v412_v23 = vld [vmem:[%s2428_s29 + $0xa8] sm:$0xff]  ;;  %v413_v28 = vld [vmem:[%s2428_s29 + $0xb0] sm:$0xff]  ;;  %v414_v30 = vld [vmem:[%s2428_s29 + $0xb8] sm:$0xff]  ;;  %2146 = vmatpush3.bf16.msra.mxu0 %v2311_v58 }
  0x16   : > { %v433_v26 = vpack.c.bf16 %v412_v23, %v411_v21  ;;  %v415_v31 = vld [vmem:[%s2428_s29 + $0xc0] sm:$0xff]  ;;  %v401_v32 = vld [vmem:[%s2428_s29 + $0x50] sm:$0xff]  ;;  %v402_v33 = vld [vmem:[%s2428_s29 + $0x58] sm:$0xff]  ;;  %v434_v37 = vpack.c.bf16 %v414_v30, %v413_v28  ;;  %2147 = vmatprep.subr.bf16.mxu0 %v2312_v59 }
  0x17   : > { %2081 = vmatprep.mubr.msk.bf16.mxu1 %vm462_vm0, %v431_v18  ;;  %v416_v34 = vld [vmem:[%s2428_s29 + $0xc8] sm:$0xff]  ;;  %v403_v35 = vld [vmem:[%s2428_s29 + $0x60] sm:$0xff]  ;;  %v428_v40 = vpack.c.bf16 %v402_v33, %v401_v32  ;;  %v417_v41 = vld [vmem:[%s2428_s29 + $0xd0] sm:$0xff] }
  0x18   : > { %2082 = vmatmul.mubr.msk.bf16.vlgmr.msra.gmra.mrb[0].mxu1 %vm462_vm0, %v432_v22  ;;  %v404_v36 = vld [vmem:[%s2428_s29 + $0x68] sm:$0xff]  ;;  %v435_v39 = vpack.c.bf16 %v416_v34, %v415_v31  ;;  %v418_v42 = vld [vmem:[%s2428_s29 + $0xd8] sm:$0xff]  ;;  %v419_v44 = vld [vmem:[%s2428_s29 + $0xe0] sm:$0xff] }
  0x19   : > { %2085 = vmatprep.mubr.msk.bf16.mxu1 %vm462_vm0, %v433_v26  ;;  %2098 = vmatpush3.bf16.msra.mxu1 %v2303_v2  ;;  %v429_v43 = vpack.c.bf16 %v404_v36, %v403_v35  ;;  %v420_v45 = vld [vmem:[%s2428_s29 + $0xe8] sm:$0xff]  ;;  %v405_v47 = vld [vmem:[%s2428_s29 + $0x70] sm:$0xff]  ;;  %v406_v48 = vld [vmem:[%s2428_s29 + $0x78] sm:$0xff]  ;;  %v436_v49 = vpack.c.bf16 %v418_v42, %v417_v41 }
  0x1a   : > { %2099 = vmatprep.subr.bf16.mxu1 %v2304_v24  ;;  %v437_v51 = vpack.c.bf16 %v420_v45, %v419_v44  ;;  %v430_v52 = vpack.c.bf16 %v406_v48, %v405_v47  ;;  %v421_v53 = vld [vmem:[%s2428_s29 + $0xf0] sm:$0xff]  ;;  %v422_v54 = vld [vmem:[%s2428_s29 + $0xf8] sm:$0xff]  ;;  %2148 = vmatpush3.bf16.msra.mxu0 %v2312_v59 }
  0x1b   : > { %v438_v55 = vpack.c.bf16 %v422_v54, %v421_v53  ;;  %2149 = vmatprep.subr.bf16.mxu0 %v2313_v60 }
  0x1c   : > { %2070 = vmatmul.mubr.msk.bf16.gmra.mrb[4].mxu0 %vm462_vm0, %v426_v25 }
  0x1d   : > { %2073 = vmatprep.mubr.msk.bf16.mxu0 %vm462_vm0, %v427_v27  ;;  %2100 = vmatpush3.bf16.msra.mxu1 %v2304_v24 }
  0x1e   : > { %2101 = vmatprep.subr.bf16.mxu1 %v2305_v29  ;;  %2150 = vmatpush3.bf16.msra.mxu0 %v2313_v60 }
  0x1f   : > { %2151 = vmatprep.subr.bf16.mxu0 %v2314_v61 }
  0x20   : > { %2086 = vmatmul.mubr.msk.bf16.gmra.mrb[4].mxu1 %vm462_vm0, %v434_v37 }
  0x21   : > { %2089 = vmatprep.mubr.msk.bf16.mxu1 %vm462_vm0, %v435_v39  ;;  %2102 = vmatpush3.bf16.msra.mxu1 %v2305_v29 }
  0x22   : > { %2103 = vmatprep.subr.bf16.mxu1 %v2306_v38  ;;  %2152 = vmatpush3.bf16.msra.mxu0 %v2314_v61 }
  0x23   : > { %2153 = vmatprep.subr.bf16.mxu0 %v2315_v62 }
  0x24   : > { %2074 = vmatmul.mubr.msk.bf16.gmra.mrb[8].mxu0 %vm462_vm0, %v428_v40 }
  0x25   : > { %2077 = vmatprep.mubr.msk.bf16.mxu0 %vm462_vm0, %v429_v43  ;;  %2104 = vmatpush3.bf16.msra.mxu1 %v2306_v38 }
  0x26   : > { %2105 = vmatprep.subr.bf16.mxu1 %v2307_v46  ;;  %2154 = vmatpush3.bf16.msra.mxu0 %v2315_v62 }
  0x27   : > { %2155 = vmatprep.subr.bf16.mxu0 %v2316_v63 }
  0x28   : > { %2090 = vmatmul.mubr.msk.bf16.gmra.mrb[8].mxu1 %vm462_vm0, %v436_v49 }
  0x29   : > { %2093 = vmatprep.mubr.msk.bf16.mxu1 %vm462_vm0, %v437_v51  ;;  %2106 = vmatpush3.bf16.msra.mxu1 %v2307_v46 }
  0x2a   : > { %2107 = vmatprep.subr.bf16.mxu1 %v2308_v50  ;;  %2156 = vmatpush3.bf16.msra.mxu0 %v2316_v63 }
  0x2c   : > { %2078 = vmatmul.mubr.msk.bf16.gmra.mrb[12].mxu0 %vm462_vm0, %v430_v52 }
  0x2d   : > { %2108 = vmatpush3.bf16.msra.mxu1 %v2308_v50 }
  0x2e   : > { %2109 = vmatprep.subr.bf16.mxu1 %v2309_v56 }
  0x30   : > { %2094 = vmatmul.mubr.msk.bf16.gmra.mrb[12].mxu1 %vm462_vm0, %v438_v55 }
  0x31   : > { %2110 = vmatpush3.bf16.msra.mxu1 %v2309_v56 }
  0x32   : > { %2111 = vmatprep.subr.bf16.mxu1 %v2310_v57 }
  0x35   : > { %2112 = vmatpush3.bf16.msra.mxu1 %v2310_v57 }
  0xe7   : > { %v2067_v1 = vpop.f32.mrb[0].mxu0 }
  0xe8   : > { %v554_v2 = vadd.f32 %v2067_v1, %v2520_v0  ;;  %v545_v3 = vpop.f32.mrb[1].mxu0 }
  0xe9   : > { %v546_v4 = vadd.f32 %v2520_v0, %v545_v3  ;;  %v2068_v5 = vpop.f32.mrb[2].mxu0 }
  0xea   : > { %v557_v6 = vadd.f32 %v2068_v5, %v2520_v0  ;;  %v548_v7 = vpop.f32.mrb[3].mxu0  ;;  %v674_v9 = vmax.f32 %v554_v2, 0.0 }
  0xeb   : > { %v549_v8 = vadd.f32 %v2520_v0, %v548_v7  ;;  %v2083_v11 = vpop.f32.mrb[0].mxu1  ;;  %v672_v12 = vmax.f32 %v546_v4, 0.0 }
  0xec   : > { %v675_v10 = vmax.f32 %v557_v6, 0.0  ;;  %v618_v14 = vadd.f32 %v2083_v11, %v2520_v0  ;;  %v609_v15 = vpop.f32.mrb[1].mxu1 }
  0xed   : > { %v673_v13 = vmax.f32 %v549_v8, 0.0  ;;  %v610_v17 = vadd.f32 %v2520_v0, %v609_v15  ;;  %v2084_v18 = vpop.f32.mrb[2].mxu1 }
  0xee   : > { %v705_v16 = vpack.c.bf16 %v675_v10, %v674_v9  ;;  %v690_v21 = vmax.f32 %v618_v14, 0.0  ;;  %v621_v22 = vadd.f32 %v2084_v18, %v2520_v0  ;;  %v612_v23 = vpop.f32.mrb[3].mxu1 }
  0xef   : > { %v704_v19 = vpack.c.bf16 %v673_v13, %v672_v12  ;;  %v2071_v20 = vpop.f32.mrb[4].mxu0  ;;  %v688_v26 = vmax.f32 %v610_v17, 0.0  ;;  %v613_v27 = vadd.f32 %v2520_v0, %v612_v23 }
  0xf0   : > { %v570_v24 = vadd.f32 %v2071_v20, %v2520_v0  ;;  %v561_v25 = vpop.f32.mrb[5].mxu0  ;;  %v691_v30 = vmax.f32 %v621_v22, 0.0 }
  0xf1   : > { %v562_v28 = vadd.f32 %v2520_v0, %v561_v25  ;;  %v2072_v29 = vpop.f32.mrb[6].mxu0  ;;  %2113 = vmatprep.mubr.bf16.mxu1 %v704_v19  ;;  %v689_v33 = vmax.f32 %v613_v27, 0.0 }
  0xf2   : > { %v573_v31 = vadd.f32 %v2072_v29, %v2520_v0  ;;  %v564_v32 = vpop.f32.mrb[7].mxu0  ;;  %2114 = vmatmul.mubr.bf16.vlgmr.msra.gmra.mrb[16].mxu1 %v705_v16  ;;  %v2534_v35 = vpack.c.bf16 %v691_v30, %v690_v21  ;;  %v678_v36 = vmax.f32 %v570_v24, 0.0 }
  0xf3   : > { %v565_v34 = vadd.f32 %v2520_v0, %v564_v32  ;;  %v2536_v38 = vpack.c.bf16 %v689_v33, %v688_v26  ;;  %v2087_v39 = vpop.f32.mrb[4].mxu1  ;;  %v676_v40 = vmax.f32 %v562_v28, 0.0 }
  0xf4   : > { %v679_v37 = vmax.f32 %v573_v31, 0.0  ;;  %v634_v42 = vadd.f32 %v2087_v39, %v2520_v0  ;;  %v625_v43 = vpop.f32.mrb[5].mxu1 }
  0xf5   : > { %v677_v41 = vmax.f32 %v565_v34, 0.0  ;;  %v626_v45 = vadd.f32 %v2520_v0, %v625_v43  ;;  %v2088_v46 = vpop.f32.mrb[6].mxu1 }
  0xf6   : > { %v707_v44 = vpack.c.bf16 %v679_v37, %v678_v36  ;;  %v694_v49 = vmax.f32 %v634_v42, 0.0  ;;  %v637_v50 = vadd.f32 %v2088_v46, %v2520_v0  ;;  %v628_v51 = vpop.f32.mrb[7].mxu1 }
  0xf7   : > { %v706_v47 = vpack.c.bf16 %v677_v41, %v676_v40  ;;  %v2075_v48 = vpop.f32.mrb[8].mxu0  ;;  %v692_v54 = vmax.f32 %v626_v45, 0.0  ;;  %v629_v55 = vadd.f32 %v2520_v0, %v628_v51 }
  0xf8   : > { %v586_v52 = vadd.f32 %v2075_v48, %v2520_v0  ;;  %v577_v53 = vpop.f32.mrb[9].mxu0  ;;  %v695_v58 = vmax.f32 %v637_v50, 0.0 }
  0xf9   : > { %v578_v56 = vadd.f32 %v2520_v0, %v577_v53  ;;  %v2076_v57 = vpop.f32.mrb[10].mxu0  ;;  %2117 = vmatprep.mubr.bf16.mxu1 %v706_v47  ;;  %v693_v61 = vmax.f32 %v629_v55, 0.0  ;;  %v2321_v53 = vld [vmem:[%s2843_s7 + $0x10] sm:$0xff]   ;;  %v2323_v55 = vld [vmem:[%s2843_s7 + $0x20] sm:$0xff]  }
  0xfa   : > { %v589_v59 = vadd.f32 %v2076_v57, %v2520_v0  ;;  %v580_v60 = vpop.f32.mrb[11].mxu0  ;;  %2118 = vmatmul.mubr.bf16.gmra.mrb[20].mxu1 %v707_v44  ;;  %v715_v63 = vpack.c.bf16 %v695_v58, %v694_v49  ;;  %v682_v1 = vmax.f32 %v586_v52, 0.0  ;;  %v2320_v52 = vld [vmem:[%s2843_s7 + $0x8] sm:$0xff]   ;;  %v2325_v57 = vld [vmem:[%s2843_s7 + $0x30] sm:$0xff]   ;;  %v2590_v58 = vld [vmem:[%s2840_s4] ss:$0 sm:$0xff] }
  0xfb   : > { %v581_v62 = vadd.f32 %v2520_v0, %v580_v60  ;;  %v714_v3 = vpack.c.bf16 %v693_v61, %v692_v54  ;;  %v2091_v4 = vpop.f32.mrb[8].mxu1  ;;  %v680_v5 = vmax.f32 %v578_v56, 0.0  ;;  %v2322_v54 = vld [vmem:[%s2843_s7 + $0x18] sm:$0xff]   ;;  %v2324_v56 = vld [vmem:[%s2843_s7 + $0x28] sm:$0xff]  }
  0xfc   : > { %v683_v2 = vmax.f32 %v589_v59, 0.0  ;;  %v650_v7 = vadd.f32 %v2091_v4, %v2520_v0  ;;  %v641_v8 = vpop.f32.mrb[9].mxu1 }
  0xfd   : > { %v681_v6 = vmax.f32 %v581_v62, 0.0  ;;  %v642_v10 = vadd.f32 %v2520_v0, %v641_v8  ;;  %v2092_v11 = vpop.f32.mrb[10].mxu1 }
  0xfe   : > { %v709_v9 = vpack.c.bf16 %v683_v2, %v682_v1  ;;  %v698_v14 = vmax.f32 %v650_v7, 0.0  ;;  %v653_v15 = vadd.f32 %v2092_v11, %v2520_v0  ;;  %v644_v16 = vpop.f32.mrb[11].mxu1 }
  0xff   : > { %v708_v12 = vpack.c.bf16 %v681_v6, %v680_v5  ;;  %v2079_v13 = vpop.f32.mrb[12].mxu0  ;;  %v696_v19 = vmax.f32 %v642_v10, 0.0  ;;  %v645_v20 = vadd.f32 %v2520_v0, %v644_v16 }
 0x100   : > { %v602_v17 = vadd.f32 %v2079_v13, %v2520_v0  ;;  %v593_v18 = vpop.f32.mrb[13].mxu0  ;;  %v699_v23 = vmax.f32 %v653_v15, 0.0 }
 0x101   : > { %v594_v21 = vadd.f32 %v2520_v0, %v593_v18  ;;  %v2080_v22 = vpop.f32.mrb[14].mxu0  ;;  %2121 = vmatprep.mubr.bf16.mxu1 %v708_v12  ;;  %v697_v26 = vmax.f32 %v645_v20, 0.0 }
 0x102   : > { %v605_v24 = vadd.f32 %v2080_v22, %v2520_v0  ;;  %v596_v25 = vpop.f32.mrb[15].mxu0  ;;  %2122 = vmatmul.mubr.bf16.gmra.mrb[24].mxu1 %v709_v9  ;;  %v717_v28 = vpack.c.bf16 %v699_v23, %v698_v14  ;;  %v686_v29 = vmax.f32 %v602_v17, 0.0 }
 0x103   : > { %v597_v27 = vadd.f32 %v2520_v0, %v596_v25  ;;  %v716_v31 = vpack.c.bf16 %v697_v26, %v696_v19  ;;  %v2095_v32 = vpop.f32.mrb[12].mxu1  ;;  %v684_v33 = vmax.f32 %v594_v21, 0.0 }
 0x104   : > { %v687_v30 = vmax.f32 %v605_v24, 0.0  ;;  %v666_v36 = vadd.f32 %v2095_v32, %v2520_v0  ;;  %v657_v37 = vpop.f32.mrb[13].mxu1 }
 0x105   : > { %v685_v34 = vmax.f32 %v597_v27, 0.0  ;;  %v658_v40 = vadd.f32 %v2520_v0, %v657_v37  ;;  %v2096_v41 = vpop.f32.mrb[14].mxu1 }
 0x106   : > { %v711_v39 = vpack.c.bf16 %v687_v30, %v686_v29  ;;  %v702_v43 = vmax.f32 %v666_v36, 0.0  ;;  %v669_v44 = vadd.f32 %v2096_v41, %v2520_v0  ;;  %v660_v45 = vpop.f32.mrb[15].mxu1 }
 0x107   : > { %v710_v42 = vpack.c.bf16 %v685_v34, %v684_v33  ;;  %v700_v46 = vmax.f32 %v658_v40, 0.0  ;;  %v661_v47 = vadd.f32 %v2520_v0, %v660_v45  ;;  %v2317_v0 = vld [vmem:[%s2841_s5 + $0x30] sm:$0xff]  }
 0x108   : > { %v703_v48 = vmax.f32 %v669_v44, 0.0  ;;  %2157 = vmatprep.subr.bf16.mxu0 %v2317_v0 }
 0x109   : > { %2125 = vmatprep.mubr.bf16.mxu1 %v710_v42  ;;  %v701_v49 = vmax.f32 %v661_v47, 0.0  ;;  %2158 = vmatpush3.bf16.msra.mxu0 %v2317_v0 }
 0x10a   : > { %2126 = vmatmul.mubr.bf16.gmra.mrb[28].mxu1 %v711_v39  ;;  %v719_v50 = vpack.c.bf16 %v703_v48, %v702_v43 }
 0x10b   : > { %2129 = vmatprep.mubr.bf16.mxu1 %v2536_v38  ;;  %v718_v51 = vpack.c.bf16 %v701_v49, %v700_v46  ;;  %v2318_v38 = vld [vmem:[%s2841_s5 + $0x38] sm:$0xff]  }
 0x10c   : > { %2159 = vmatprep.subr.bf16.mxu0 %v2318_v38 }
 0x10d   : > { %2160 = vmatpush3.bf16.msra.mxu0 %v2318_v38 }
 0x112   : > { %2130 = vmatmul.mubr.bf16.gmra.mrb[32].mxu1 %v2534_v35  ;;  %v2319_v35 = vld [vmem:[%s2843_s7] sm:$0xff]  }
 0x113   : > { %2133 = vmatprep.mubr.bf16.mxu1 %v714_v3  ;;  %2193 = vmatprep.subr.bf16.mxu1 %v2319_v35 }
 0x114   : > { %2194 = vmatpush3.bf16.msra.mxu1 %v2319_v35 }
 0x115   : > { %2195 = vmatprep.subr.bf16.mxu1 %v2320_v52 }
 0x118   : > { %2196 = vmatpush3.bf16.msra.mxu1 %v2320_v52 }
 0x119   : > { %2197 = vmatprep.subr.bf16.mxu1 %v2321_v53 }
 0x11a   : > { %2134 = vmatmul.mubr.bf16.gmra.mrb[36].mxu1 %v715_v63 }
 0x11b   : > { %2137 = vmatprep.mubr.bf16.mxu1 %v716_v31 }
 0x11c   : > { %2198 = vmatpush3.bf16.msra.mxu1 %v2321_v53 }
 0x11d   : > { %2199 = vmatprep.subr.bf16.mxu1 %v2322_v54 }
 0x120   : > { %2200 = vmatpush3.bf16.msra.mxu1 %v2322_v54 }
 0x121   : > { %2201 = vmatprep.subr.bf16.mxu1 %v2323_v55 }
 0x122   : > { %2138 = vmatmul.mubr.bf16.gmra.mrb[40].mxu1 %v717_v28 }
 0x123   : > { %2141 = vmatprep.mubr.bf16.mxu1 %v718_v51 }
 0x124   : > { %2202 = vmatpush3.bf16.msra.mxu1 %v2323_v55 }
 0x125   : > { %2203 = vmatprep.subr.bf16.mxu1 %v2324_v56 }
 0x128   : > { %2204 = vmatpush3.bf16.msra.mxu1 %v2324_v56 }
 0x129   : > { %2205 = vmatprep.subr.bf16.mxu1 %v2325_v57 }
 0x12a   : > { %2142 = vmatmul.mubr.bf16.gmra.mrb[44].mxu1 %v719_v50 }
 0x12c   : > { %2206 = vmatpush3.bf16.msra.mxu1 %v2325_v57 }
 0x1c5   : > { %v2115_v59 = vpop.f32.mrb[16].mxu1 }
 0x1c6   : > { %v834_v60 = vadd.f32 %v2115_v59, %v2590_v58  ;;  %v825_v61 = vpop.f32.mrb[17].mxu1 }
 0x1c7   : > { %v826_v62 = vadd.f32 %v2590_v58, %v825_v61  ;;  %v2116_v63 = vpop.f32.mrb[18].mxu1 }
 0x1c8   : > { %v837_v1 = vadd.f32 %v2116_v63, %v2590_v58  ;;  %v828_v2 = vpop.f32.mrb[19].mxu1  ;;  %v954_v4 = vmax.f32 %v834_v60, 0.0 }
 0x1c9   : > { %v829_v3 = vadd.f32 %v2590_v58, %v828_v2  ;;  %v952_v6 = vmax.f32 %v826_v62, 0.0 }
 0x1ca   : > { %v955_v5 = vmax.f32 %v837_v1, 0.0 }
 0x1cb   : > { %v953_v7 = vmax.f32 %v829_v3, 0.0 }
 0x1cc   : > { %v985_v8 = vpack.c.bf16 %v955_v5, %v954_v4 }
 0x1cd   : > { %v984_v9 = vpack.c.bf16 %v953_v7, %v952_v6  ;;  %v2119_v10 = vpop.f32.mrb[20].mxu1 }
 0x1ce   : > { %v850_v11 = vadd.f32 %v2119_v10, %v2590_v58  ;;  %v841_v12 = vpop.f32.mrb[21].mxu1 }
 0x1cf   : > { %v842_v13 = vadd.f32 %v2590_v58, %v841_v12  ;;  %v2120_v14 = vpop.f32.mrb[22].mxu1  ;;  %2161 = vmatprep.mubr.bf16.mxu0 %v984_v9 }
 0x1d0   : > { %v853_v15 = vadd.f32 %v2120_v14, %v2590_v58  ;;  %v844_v16 = vpop.f32.mrb[23].mxu1  ;;  %2162 = vmatmul.mubr.bf16.vlgmr.msra.gmra.mrb[16].mxu0 %v985_v8  ;;  %v958_v18 = vmax.f32 %v850_v11, 0.0 }
 0x1d1   : > { %v845_v17 = vadd.f32 %v2590_v58, %v844_v16  ;;  %v956_v20 = vmax.f32 %v842_v13, 0.0 }
 0x1d2   : > { %v959_v19 = vmax.f32 %v853_v15, 0.0 }
 0x1d3   : > { %v957_v21 = vmax.f32 %v845_v17, 0.0 }
 0x1d4   : > { %v987_v22 = vpack.c.bf16 %v959_v19, %v958_v18 }
 0x1d5   : > { %v986_v23 = vpack.c.bf16 %v957_v21, %v956_v20  ;;  %v2123_v24 = vpop.f32.mrb[24].mxu1 }
 0x1d6   : > { %v866_v25 = vadd.f32 %v2123_v24, %v2590_v58  ;;  %v857_v26 = vpop.f32.mrb[25].mxu1 }
 0x1d7   : > { %v858_v27 = vadd.f32 %v2590_v58, %v857_v26  ;;  %v2124_v28 = vpop.f32.mrb[26].mxu1  ;;  %2165 = vmatprep.mubr.bf16.mxu0 %v986_v23 }
 0x1d8   : > { %v869_v29 = vadd.f32 %v2124_v28, %v2590_v58  ;;  %v860_v30 = vpop.f32.mrb[27].mxu1  ;;  %2166 = vmatmul.mubr.bf16.gmra.mrb[20].mxu0 %v987_v22  ;;  %v962_v32 = vmax.f32 %v866_v25, 0.0 }
 0x1d9   : > { %v861_v31 = vadd.f32 %v2590_v58, %v860_v30  ;;  %v960_v34 = vmax.f32 %v858_v27, 0.0 }
 0x1da   : > { %v963_v33 = vmax.f32 %v869_v29, 0.0 }
 0x1db   : > { %v961_v36 = vmax.f32 %v861_v31, 0.0 }
 0x1dc   : > { %v989_v37 = vpack.c.bf16 %v963_v33, %v962_v32 }
 0x1dd   : > { %v988_v39 = vpack.c.bf16 %v961_v36, %v960_v34  ;;  %v2127_v40 = vpop.f32.mrb[28].mxu1 }
 0x1de   : > { %v882_v41 = vadd.f32 %v2127_v40, %v2590_v58  ;;  %v873_v42 = vpop.f32.mrb[29].mxu1 }
 0x1df   : > { %v874_v43 = vadd.f32 %v2590_v58, %v873_v42  ;;  %v2128_v44 = vpop.f32.mrb[30].mxu1  ;;  %2169 = vmatprep.mubr.bf16.mxu0 %v988_v39 }
 0x1e0   : > { %v885_v45 = vadd.f32 %v2128_v44, %v2590_v58  ;;  %v876_v46 = vpop.f32.mrb[31].mxu1  ;;  %2170 = vmatmul.mubr.bf16.gmra.mrb[24].mxu0 %v989_v37  ;;  %v966_v48 = vmax.f32 %v882_v41, 0.0 }
 0x1e1   : > { %v877_v47 = vadd.f32 %v2590_v58, %v876_v46  ;;  %v964_v50 = vmax.f32 %v874_v43, 0.0 }
 0x1e2   : > { %v967_v49 = vmax.f32 %v885_v45, 0.0 }
 0x1e3   : > { %v965_v51 = vmax.f32 %v877_v47, 0.0  ;;  %v2326_v47 = vld [vmem:[%s2843_s7 + $0x38] sm:$0xff]  }
 0x1e4   : > { %v991_v0 = vpack.c.bf16 %v967_v49, %v966_v48  ;;  %2207 = vmatprep.subr.bf16.mxu1 %v2326_v47  ;;  %v2327_v48 = vld [vmem:[%s2845_s9] sm:$0xff]   ;;  %v2329_v49 = vld [vmem:[%s2845_s9 + $0x10] sm:$0xff]  }
 0x1e5   : > { %v990_v38 = vpack.c.bf16 %v965_v51, %v964_v50  ;;  %v2131_v35 = vpop.f32.mrb[32].mxu1  ;;  %2208 = vmatpush3.bf16.msra.mxu1 %v2326_v47  ;;  %2241 = vmatprep.subr.bf16.mxu0 %v2327_v48  ;;  %v2330_v50 = vld [vmem:[%s2845_s9 + $0x18] sm:$0xff]   ;;  %v2331_v51 = vld [vmem:[%s2845_s9 + $0x20] sm:$0xff]  }
 0x1e6   : > { %v898_v52 = vadd.f32 %v2131_v35, %v2590_v58  ;;  %v889_v53 = vpop.f32.mrb[33].mxu1  ;;  %2242 = vmatpush3.bf16.msra.mxu0 %v2327_v48  ;;  %v2651_v35 = vld [vmem:[%s2842_s6] ss:$0 sm:$0xff] }
 0x1e7   : > { %v890_v54 = vadd.f32 %v2590_v58, %v889_v53  ;;  %v2132_v55 = vpop.f32.mrb[34].mxu1  ;;  %2173 = vmatprep.mubr.bf16.mxu0 %v990_v38  ;;  %v2333_v38 = vld [vmem:[%s2845_s9 + $0x30] sm:$0xff]  }
 0x1e8   : > { %v901_v56 = vadd.f32 %v2132_v55, %v2590_v58  ;;  %v892_v57 = vpop.f32.mrb[35].mxu1  ;;  %2174 = vmatmul.mubr.bf16.gmra.mrb[28].mxu0 %v991_v0  ;;  %v970_v60 = vmax.f32 %v898_v52, 0.0  ;;  %v2332_v0 = vld [vmem:[%s2845_s9 + $0x28] sm:$0xff]  }
 0x1e9   : > { %v893_v59 = vadd.f32 %v2590_v58, %v892_v57  ;;  %v968_v62 = vmax.f32 %v890_v54, 0.0 }
 0x1ea   : > { %v971_v61 = vmax.f32 %v901_v56, 0.0 }
 0x1eb   : > { %v969_v63 = vmax.f32 %v893_v59, 0.0 }
 0x1ec   : > { %v993_v1 = vpack.c.bf16 %v971_v61, %v970_v60 }
 0x1ed   : > { %v992_v2 = vpack.c.bf16 %v969_v63, %v968_v62  ;;  %v2135_v3 = vpop.f32.mrb[36].mxu1 }
 0x1ee   : > { %v914_v4 = vadd.f32 %v2135_v3, %v2590_v58  ;;  %v905_v5 = vpop.f32.mrb[37].mxu1 }
 0x1ef   : > { %v906_v6 = vadd.f32 %v2590_v58, %v905_v5  ;;  %v2136_v7 = vpop.f32.mrb[38].mxu1  ;;  %2177 = vmatprep.mubr.bf16.mxu0 %v992_v2 }
 0x1f0   : > { %v917_v8 = vadd.f32 %v2136_v7, %v2590_v58  ;;  %v908_v9 = vpop.f32.mrb[39].mxu1  ;;  %2178 = vmatmul.mubr.bf16.gmra.mrb[32].mxu0 %v993_v1  ;;  %v974_v11 = vmax.f32 %v914_v4, 0.0 }
 0x1f1   : > { %v909_v10 = vadd.f32 %v2590_v58, %v908_v9  ;;  %v972_v13 = vmax.f32 %v906_v6, 0.0 }
 0x1f2   : > { %v975_v12 = vmax.f32 %v917_v8, 0.0 }
 0x1f3   : > { %v973_v14 = vmax.f32 %v909_v10, 0.0 }
 0x1f4   : > { %v995_v15 = vpack.c.bf16 %v975_v12, %v974_v11 }
 0x1f5   : > { %v994_v16 = vpack.c.bf16 %v973_v14, %v972_v13  ;;  %v2139_v17 = vpop.f32.mrb[40].mxu1 }
 0x1f6   : > { %v930_v18 = vadd.f32 %v2139_v17, %v2590_v58  ;;  %v921_v19 = vpop.f32.mrb[41].mxu1 }
 0x1f7   : > { %v922_v20 = vadd.f32 %v2590_v58, %v921_v19  ;;  %v2140_v21 = vpop.f32.mrb[42].mxu1  ;;  %2181 = vmatprep.mubr.bf16.mxu0 %v994_v16 }
 0x1f8   : > { %v933_v22 = vadd.f32 %v2140_v21, %v2590_v58  ;;  %v924_v23 = vpop.f32.mrb[43].mxu1  ;;  %2182 = vmatmul.mubr.bf16.gmra.mrb[36].mxu0 %v995_v15  ;;  %v978_v25 = vmax.f32 %v930_v18, 0.0 }
 0x1f9   : > { %v925_v24 = vadd.f32 %v2590_v58, %v924_v23  ;;  %v976_v27 = vmax.f32 %v922_v20, 0.0 }
 0x1fa   : > { %v979_v26 = vmax.f32 %v933_v22, 0.0 }
 0x1fb   : > { %v977_v28 = vmax.f32 %v925_v24, 0.0 }
 0x1fc   : > { %v997_v29 = vpack.c.bf16 %v979_v26, %v978_v25 }
 0x1fd   : > { %v996_v30 = vpack.c.bf16 %v977_v28, %v976_v27  ;;  %v2143_v31 = vpop.f32.mrb[44].mxu1 }
 0x1fe   : > { %v946_v32 = vadd.f32 %v2143_v31, %v2590_v58  ;;  %v937_v33 = vpop.f32.mrb[45].mxu1 }
 0x1ff   : > { %v938_v34 = vadd.f32 %v2590_v58, %v937_v33  ;;  %v2144_v36 = vpop.f32.mrb[46].mxu1  ;;  %2185 = vmatprep.mubr.bf16.mxu0 %v996_v30 }
 0x200   : > { %v949_v37 = vadd.f32 %v2144_v36, %v2590_v58  ;;  %v940_v39 = vpop.f32.mrb[47].mxu1  ;;  %2186 = vmatmul.mubr.bf16.gmra.mrb[40].mxu0 %v997_v29  ;;  %v982_v41 = vmax.f32 %v946_v32, 0.0 }
 0x201   : > { %v941_v40 = vadd.f32 %v2590_v58, %v940_v39  ;;  %v980_v43 = vmax.f32 %v938_v34, 0.0  ;;  %v2328_v58 = vld [vmem:[%s2845_s9 + $0x8] sm:$0xff]  }
 0x202   : > { %v983_v42 = vmax.f32 %v949_v37, 0.0  ;;  %2243 = vmatprep.subr.bf16.mxu0 %v2328_v58 }
 0x203   : > { %v981_v44 = vmax.f32 %v941_v40, 0.0  ;;  %2244 = vmatpush3.bf16.msra.mxu0 %v2328_v58 }
 0x204   : > { %v999_v45 = vpack.c.bf16 %v983_v42, %v982_v41  ;;  %2245 = vmatprep.subr.bf16.mxu0 %v2329_v49 }
 0x205   : > { %v998_v46 = vpack.c.bf16 %v981_v44, %v980_v43 }
 0x207   : > { %2189 = vmatprep.mubr.bf16.mxu0 %v998_v46  ;;  %2246 = vmatpush3.bf16.msra.mxu0 %v2329_v49 }
 0x208   : > { %2190 = vmatmul.mubr.bf16.gmra.mrb[44].mxu0 %v999_v45  ;;  %2247 = vmatprep.subr.bf16.mxu0 %v2330_v50 }
 0x20b   : > { %2248 = vmatpush3.bf16.msra.mxu0 %v2330_v50 }
 0x20c   : > { %2249 = vmatprep.subr.bf16.mxu0 %v2331_v51 }
 0x20f   : > { %2250 = vmatpush3.bf16.msra.mxu0 %v2331_v51 }
 0x210   : > { %2251 = vmatprep.subr.bf16.mxu0 %v2332_v0 }
 0x213   : > { %2252 = vmatpush3.bf16.msra.mxu0 %v2332_v0 }
 0x214   : > { %2253 = vmatprep.subr.bf16.mxu0 %v2333_v38 }
 0x217   : > { %2254 = vmatpush3.bf16.msra.mxu0 %v2333_v38 }
 0x2a3   : > { %v2163_v52 = vpop.f32.mrb[16].mxu0 }
 0x2a4   : > { %v1114_v53 = vadd.f32 %v2163_v52, %v2651_v35  ;;  %v1105_v54 = vpop.f32.mrb[17].mxu0 }
 0x2a5   : > { %v1106_v55 = vadd.f32 %v2651_v35, %v1105_v54  ;;  %v2164_v56 = vpop.f32.mrb[18].mxu0 }
 0x2a6   : > { %v1117_v57 = vadd.f32 %v2164_v56, %v2651_v35  ;;  %v1108_v59 = vpop.f32.mrb[19].mxu0  ;;  %v1234_v61 = vmax.f32 %v1114_v53, 0.0 }
 0x2a7   : > { %v1109_v60 = vadd.f32 %v2651_v35, %v1108_v59  ;;  %v1232_v63 = vmax.f32 %v1106_v55, 0.0 }
 0x2a8   : > { %v1235_v62 = vmax.f32 %v1117_v57, 0.0 }
 0x2a9   : > { %v1233_v1 = vmax.f32 %v1109_v60, 0.0 }
 0x2aa   : > { %v1265_v2 = vpack.c.bf16 %v1235_v62, %v1234_v61 }
 0x2ab   : > { %v1264_v3 = vpack.c.bf16 %v1233_v1, %v1232_v63  ;;  %v2167_v4 = vpop.f32.mrb[20].mxu0 }
 0x2ac   : > { %v1130_v5 = vadd.f32 %v2167_v4, %v2651_v35  ;;  %v1121_v6 = vpop.f32.mrb[21].mxu0 }
 0x2ad   : > { %v1122_v7 = vadd.f32 %v2651_v35, %v1121_v6  ;;  %v2168_v8 = vpop.f32.mrb[22].mxu0  ;;  %2209 = vmatprep.mubr.bf16.mxu1 %v1264_v3 }
 0x2ae   : > { %v1133_v9 = vadd.f32 %v2168_v8, %v2651_v35  ;;  %v1124_v10 = vpop.f32.mrb[23].mxu0  ;;  %2210 = vmatmul.mubr.bf16.vlgmr.msra.gmra.mrb[48].mxu1 %v1265_v2  ;;  %v1238_v12 = vmax.f32 %v1130_v5, 0.0 }
 0x2af   : > { %v1125_v11 = vadd.f32 %v2651_v35, %v1124_v10  ;;  %v1236_v14 = vmax.f32 %v1122_v7, 0.0 }
 0x2b0   : > { %v1239_v13 = vmax.f32 %v1133_v9, 0.0 }
 0x2b1   : > { %v1237_v15 = vmax.f32 %v1125_v11, 0.0 }
 0x2b2   : > { %v1267_v16 = vpack.c.bf16 %v1239_v13, %v1238_v12 }
 0x2b3   : > { %v1266_v17 = vpack.c.bf16 %v1237_v15, %v1236_v14  ;;  %v2171_v18 = vpop.f32.mrb[24].mxu0 }
 0x2b4   : > { %v1146_v19 = vadd.f32 %v2171_v18, %v2651_v35  ;;  %v1137_v20 = vpop.f32.mrb[25].mxu0 }
 0x2b5   : > { %v1138_v21 = vadd.f32 %v2651_v35, %v1137_v20  ;;  %v2172_v22 = vpop.f32.mrb[26].mxu0  ;;  %2213 = vmatprep.mubr.bf16.mxu1 %v1266_v17 }
 0x2b6   : > { %v1149_v23 = vadd.f32 %v2172_v22, %v2651_v35  ;;  %v1140_v24 = vpop.f32.mrb[27].mxu0  ;;  %2214 = vmatmul.mubr.bf16.gmra.mrb[52].mxu1 %v1267_v16  ;;  %v1242_v26 = vmax.f32 %v1146_v19, 0.0 }
 0x2b7   : > { %v1141_v25 = vadd.f32 %v2651_v35, %v1140_v24  ;;  %v1240_v28 = vmax.f32 %v1138_v21, 0.0 }
 0x2b8   : > { %v1243_v27 = vmax.f32 %v1149_v23, 0.0 }
 0x2b9   : > { %v1241_v29 = vmax.f32 %v1141_v25, 0.0 }
 0x2ba   : > { %v1269_v30 = vpack.c.bf16 %v1243_v27, %v1242_v26 }
 0x2bb   : > { %v1268_v31 = vpack.c.bf16 %v1241_v29, %v1240_v28  ;;  %v2175_v32 = vpop.f32.mrb[28].mxu0 }
 0x2bc   : > { %v1162_v33 = vadd.f32 %v2175_v32, %v2651_v35  ;;  %v1153_v34 = vpop.f32.mrb[29].mxu0 }
 0x2bd   : > { %v1154_v36 = vadd.f32 %v2651_v35, %v1153_v34  ;;  %v2176_v37 = vpop.f32.mrb[30].mxu0  ;;  %2217 = vmatprep.mubr.bf16.mxu1 %v1268_v31 }
 0x2be   : > { %v1165_v39 = vadd.f32 %v2176_v37, %v2651_v35  ;;  %v1156_v40 = vpop.f32.mrb[31].mxu0  ;;  %2218 = vmatmul.mubr.bf16.gmra.mrb[56].mxu1 %v1269_v30  ;;  %v1246_v42 = vmax.f32 %v1162_v33, 0.0 }
 0x2bf   : > { %v1157_v41 = vadd.f32 %v2651_v35, %v1156_v40  ;;  %v1244_v44 = vmax.f32 %v1154_v36, 0.0 }
 0x2c0   : > { %v1247_v43 = vmax.f32 %v1165_v39, 0.0 }
 0x2c1   : > { %v1245_v45 = vmax.f32 %v1157_v41, 0.0  ;;  %v2334_v41 = vld [vmem:[%s2845_s9 + $0x38] sm:$0xff]  }
 0x2c2   : > { %v1271_v46 = vpack.c.bf16 %v1247_v43, %v1246_v42  ;;  %2255 = vmatprep.subr.bf16.mxu0 %v2334_v41  ;;  %v2691_v42 = vld [vmem:[%s2844_s8] ss:$0 sm:$0xff] }
 0x2c3   : > { %v1270_v47 = vpack.c.bf16 %v1245_v45, %v1244_v44  ;;  %v2179_v48 = vpop.f32.mrb[32].mxu0  ;;  %2256 = vmatpush3.bf16.msra.mxu0 %v2334_v41 }
 0x2c4   : > { %v1178_v58 = vadd.f32 %v2179_v48, %v2651_v35  ;;  %v1169_v49 = vpop.f32.mrb[33].mxu0 }
 0x2c5   : > { %v1170_v50 = vadd.f32 %v2651_v35, %v1169_v49  ;;  %v2180_v51 = vpop.f32.mrb[34].mxu0  ;;  %2221 = vmatprep.mubr.bf16.mxu1 %v1270_v47 }
 0x2c6   : > { %v1181_v0 = vadd.f32 %v2180_v51, %v2651_v35  ;;  %v1172_v38 = vpop.f32.mrb[35].mxu0  ;;  %2222 = vmatmul.mubr.bf16.gmra.mrb[60].mxu1 %v1271_v46  ;;  %v1250_v53 = vmax.f32 %v1178_v58, 0.0 }
 0x2c7   : > { %v1173_v52 = vadd.f32 %v2651_v35, %v1172_v38  ;;  %v1248_v55 = vmax.f32 %v1170_v50, 0.0 }
 0x2c8   : > { %v1251_v54 = vmax.f32 %v1181_v0, 0.0 }
 0x2c9   : > { %v1249_v56 = vmax.f32 %v1173_v52, 0.0 }
 0x2ca   : > { %v1273_v57 = vpack.c.bf16 %v1251_v54, %v1250_v53 }
 0x2cb   : > { %v1272_v59 = vpack.c.bf16 %v1249_v56, %v1248_v55  ;;  %v2183_v60 = vpop.f32.mrb[36].mxu0 }
 0x2cc   : > { %v1194_v61 = vadd.f32 %v2183_v60, %v2651_v35  ;;  %v1185_v62 = vpop.f32.mrb[37].mxu0 }
 0x2cd   : > { %v1186_v63 = vadd.f32 %v2651_v35, %v1185_v62  ;;  %v2184_v1 = vpop.f32.mrb[38].mxu0  ;;  %2225 = vmatprep.mubr.bf16.mxu1 %v1272_v59 }
 0x2ce   : > { %v1197_v2 = vadd.f32 %v2184_v1, %v2651_v35  ;;  %v1188_v3 = vpop.f32.mrb[39].mxu0  ;;  %2226 = vmatmul.mubr.bf16.gmra.mrb[64].mxu1 %v1273_v57  ;;  %v1254_v5 = vmax.f32 %v1194_v61, 0.0 }
 0x2cf   : > { %v1189_v4 = vadd.f32 %v2651_v35, %v1188_v3  ;;  %v1252_v7 = vmax.f32 %v1186_v63, 0.0 }
 0x2d0   : > { %v1255_v6 = vmax.f32 %v1197_v2, 0.0 }
 0x2d1   : > { %v1253_v8 = vmax.f32 %v1189_v4, 0.0 }
 0x2d2   : > { %v1275_v9 = vpack.c.bf16 %v1255_v6, %v1254_v5 }
 0x2d3   : > { %v1274_v10 = vpack.c.bf16 %v1253_v8, %v1252_v7  ;;  %v2187_v11 = vpop.f32.mrb[40].mxu0 }
 0x2d4   : > { %v1210_v12 = vadd.f32 %v2187_v11, %v2651_v35  ;;  %v1201_v13 = vpop.f32.mrb[41].mxu0 }
 0x2d5   : > { %v1202_v14 = vadd.f32 %v2651_v35, %v1201_v13  ;;  %v2188_v15 = vpop.f32.mrb[42].mxu0  ;;  %2229 = vmatprep.mubr.bf16.mxu1 %v1274_v10 }
 0x2d6   : > { %v1213_v16 = vadd.f32 %v2188_v15, %v2651_v35  ;;  %v1204_v17 = vpop.f32.mrb[43].mxu0  ;;  %2230 = vmatmul.mubr.bf16.gmra.mrb[68].mxu1 %v1275_v9  ;;  %v1258_v19 = vmax.f32 %v1210_v12, 0.0 }
 0x2d7   : > { %v1205_v18 = vadd.f32 %v2651_v35, %v1204_v17  ;;  %v1256_v21 = vmax.f32 %v1202_v14, 0.0 }
 0x2d8   : > { %v1259_v20 = vmax.f32 %v1213_v16, 0.0 }
 0x2d9   : > { %v1257_v22 = vmax.f32 %v1205_v18, 0.0 }
 0x2da   : > { %v1277_v23 = vpack.c.bf16 %v1259_v20, %v1258_v19 }
 0x2db   : > { %v1276_v24 = vpack.c.bf16 %v1257_v22, %v1256_v21  ;;  %v2191_v25 = vpop.f32.mrb[44].mxu0 }
 0x2dc   : > { %v1226_v26 = vadd.f32 %v2191_v25, %v2651_v35  ;;  %v1217_v27 = vpop.f32.mrb[45].mxu0 }
 0x2dd   : > { %v1218_v28 = vadd.f32 %v2651_v35, %v1217_v27  ;;  %v2192_v29 = vpop.f32.mrb[46].mxu0  ;;  %2233 = vmatprep.mubr.bf16.mxu1 %v1276_v24 }
 0x2de   : > { %v1229_v30 = vadd.f32 %v2192_v29, %v2651_v35  ;;  %v1220_v31 = vpop.f32.mrb[47].mxu0  ;;  %2234 = vmatmul.mubr.bf16.gmra.mrb[72].mxu1 %v1277_v23  ;;  %v1262_v33 = vmax.f32 %v1226_v26, 0.0 }
 0x2df   : > { %v1221_v32 = vadd.f32 %v2651_v35, %v1220_v31  ;;  %v1260_v36 = vmax.f32 %v1218_v28, 0.0 }
 0x2e0   : > { %v1263_v34 = vmax.f32 %v1229_v30, 0.0 }
 0x2e1   : > { %v1261_v37 = vmax.f32 %v1221_v32, 0.0 }
 0x2e2   : > { %v1279_v39 = vpack.c.bf16 %v1263_v34, %v1262_v33 }
 0x2e3   : > { %v1278_v40 = vpack.c.bf16 %v1261_v37, %v1260_v36 }
 0x2e5   : > { %2237 = vmatprep.mubr.bf16.mxu1 %v1278_v40 }
 0x2e6   : > { %2238 = vmatmul.mubr.bf16.gmra.mrb[76].mxu1 %v1279_v39 }
 0x381   : > { %v2211_v35 = vpop.f32.mrb[48].mxu1 }
 0x382   : > { %v1394_v43 = vadd.f32 %v2211_v35, %v2691_v42  ;;  %v1385_v44 = vpop.f32.mrb[49].mxu1 }
 0x383   : > { %v1386_v45 = vadd.f32 %v2691_v42, %v1385_v44  ;;  %v2212_v46 = vpop.f32.mrb[50].mxu1 }
 0x384   : > { %v1397_v47 = vadd.f32 %v2212_v46, %v2691_v42  ;;  %v1388_v48 = vpop.f32.mrb[51].mxu1  ;;  %v1514_v49 = vmax.f32 %v1394_v43, 0.0 }
 0x385   : > { %v1389_v58 = vadd.f32 %v2691_v42, %v1388_v48  ;;  %v1512_v51 = vmax.f32 %v1386_v45, 0.0 }
 0x386   : > { %v1515_v50 = vmax.f32 %v1397_v47, 0.0 }
 0x387   : > { %v1513_v0 = vmax.f32 %v1389_v58, 0.0 }
 0x388   : > { %v1545_v38 = vpack.c.bf16 %v1515_v50, %v1514_v49 }
 0x389   : > { %v1544_v52 = vpack.c.bf16 %v1513_v0, %v1512_v51  ;;  %v2215_v53 = vpop.f32.mrb[52].mxu1 }
 0x38a   : > { %v1410_v54 = vadd.f32 %v2215_v53, %v2691_v42  ;;  %v1401_v55 = vpop.f32.mrb[53].mxu1 }
 0x38b   : > { %v1402_v56 = vadd.f32 %v2691_v42, %v1401_v55  ;;  %v2216_v57 = vpop.f32.mrb[54].mxu1  ;;  %2257 = vmatprep.mubr.bf16.mxu0 %v1544_v52 }
 0x38c   : > { %v1413_v59 = vadd.f32 %v2216_v57, %v2691_v42  ;;  %v1404_v60 = vpop.f32.mrb[55].mxu1  ;;  %2258 = vmatmul.mubr.bf16.vlgmr.msra.gmra.mrb[48].mxu0 %v1545_v38  ;;  %v1518_v62 = vmax.f32 %v1410_v54, 0.0 }
 0x38d   : > { %v1405_v61 = vadd.f32 %v2691_v42, %v1404_v60  ;;  %v1516_v1 = vmax.f32 %v1402_v56, 0.0 }
 0x38e   : > { %v1519_v63 = vmax.f32 %v1413_v59, 0.0 }
 0x38f   : > { %v1517_v2 = vmax.f32 %v1405_v61, 0.0 }
 0x390   : > { %v1547_v3 = vpack.c.bf16 %v1519_v63, %v1518_v62 }
 0x391   : > { %v1546_v4 = vpack.c.bf16 %v1517_v2, %v1516_v1  ;;  %v2219_v5 = vpop.f32.mrb[56].mxu1 }
 0x392   : > { %v1426_v6 = vadd.f32 %v2219_v5, %v2691_v42  ;;  %v1417_v7 = vpop.f32.mrb[57].mxu1 }
 0x393   : > { %v1418_v8 = vadd.f32 %v2691_v42, %v1417_v7  ;;  %v2220_v9 = vpop.f32.mrb[58].mxu1  ;;  %2261 = vmatprep.mubr.bf16.mxu0 %v1546_v4 }
 0x394   : > { %v1429_v10 = vadd.f32 %v2220_v9, %v2691_v42  ;;  %v1420_v11 = vpop.f32.mrb[59].mxu1  ;;  %2262 = vmatmul.mubr.bf16.gmra.mrb[52].mxu0 %v1547_v3  ;;  %v1522_v13 = vmax.f32 %v1426_v6, 0.0 }
 0x395   : > { %v1421_v12 = vadd.f32 %v2691_v42, %v1420_v11  ;;  %v1520_v15 = vmax.f32 %v1418_v8, 0.0 }
 0x396   : > { %v1523_v14 = vmax.f32 %v1429_v10, 0.0 }
 0x397   : > { %v1521_v16 = vmax.f32 %v1421_v12, 0.0 }
 0x398   : > { %v1549_v17 = vpack.c.bf16 %v1523_v14, %v1522_v13 }
 0x399   : > { %v1548_v18 = vpack.c.bf16 %v1521_v16, %v1520_v15  ;;  %v2223_v19 = vpop.f32.mrb[60].mxu1 }
 0x39a   : > { %v1442_v20 = vadd.f32 %v2223_v19, %v2691_v42  ;;  %v1433_v21 = vpop.f32.mrb[61].mxu1 }
 0x39b   : > { %v1434_v22 = vadd.f32 %v2691_v42, %v1433_v21  ;;  %v2224_v23 = vpop.f32.mrb[62].mxu1  ;;  %2265 = vmatprep.mubr.bf16.mxu0 %v1548_v18 }
 0x39c   : > { %v1445_v24 = vadd.f32 %v2224_v23, %v2691_v42  ;;  %v1436_v25 = vpop.f32.mrb[63].mxu1  ;;  %2266 = vmatmul.mubr.bf16.gmra.mrb[56].mxu0 %v1549_v17  ;;  %v1526_v27 = vmax.f32 %v1442_v20, 0.0 }
 0x39d   : > { %v1437_v26 = vadd.f32 %v2691_v42, %v1436_v25  ;;  %v1524_v29 = vmax.f32 %v1434_v22, 0.0 }
 0x39e   : > { %v1527_v28 = vmax.f32 %v1445_v24, 0.0 }
 0x39f   : > { %v1525_v30 = vmax.f32 %v1437_v26, 0.0  ;;  %v2728_v26 = vld [vmem:[%s2846_s10] ss:$0 sm:$0xff] }
 0x3a0   : > { %v1551_v31 = vpack.c.bf16 %v1527_v28, %v1526_v27 }
 0x3a1   : > { %v1550_v32 = vpack.c.bf16 %v1525_v30, %v1524_v29  ;;  %v2227_v33 = vpop.f32.mrb[64].mxu1 }
 0x3a2   : > { %v1458_v34 = vadd.f32 %v2227_v33, %v2691_v42  ;;  %v1449_v36 = vpop.f32.mrb[65].mxu1 }
 0x3a3   : > { %v1450_v37 = vadd.f32 %v2691_v42, %v1449_v36  ;;  %v2228_v39 = vpop.f32.mrb[66].mxu1  ;;  %2269 = vmatprep.mubr.bf16.mxu0 %v1550_v32 }
 0x3a4   : > { %v1461_v40 = vadd.f32 %v2228_v39, %v2691_v42  ;;  %v1452_v41 = vpop.f32.mrb[67].mxu1  ;;  %2270 = vmatmul.mubr.bf16.gmra.mrb[60].mxu0 %v1551_v31  ;;  %v1530_v43 = vmax.f32 %v1458_v34, 0.0 }
 0x3a5   : > { %v1453_v35 = vadd.f32 %v2691_v42, %v1452_v41  ;;  %v1528_v45 = vmax.f32 %v1450_v37, 0.0 }
 0x3a6   : > { %v1531_v44 = vmax.f32 %v1461_v40, 0.0 }
 0x3a7   : > { %v1529_v46 = vmax.f32 %v1453_v35, 0.0 }
 0x3a8   : > { %v1553_v47 = vpack.c.bf16 %v1531_v44, %v1530_v43 }
 0x3a9   : > { %v1552_v48 = vpack.c.bf16 %v1529_v46, %v1528_v45  ;;  %v2231_v58 = vpop.f32.mrb[68].mxu1 }
 0x3aa   : > { %v1474_v49 = vadd.f32 %v2231_v58, %v2691_v42  ;;  %v1465_v50 = vpop.f32.mrb[69].mxu1 }
 0x3ab   : > { %v1466_v51 = vadd.f32 %v2691_v42, %v1465_v50  ;;  %v2232_v0 = vpop.f32.mrb[70].mxu1  ;;  %2273 = vmatprep.mubr.bf16.mxu0 %v1552_v48 }
 0x3ac   : > { %v1477_v38 = vadd.f32 %v2232_v0, %v2691_v42  ;;  %v1468_v52 = vpop.f32.mrb[71].mxu1  ;;  %2274 = vmatmul.mubr.bf16.gmra.mrb[64].mxu0 %v1553_v47  ;;  %v1534_v54 = vmax.f32 %v1474_v49, 0.0 }
 0x3ad   : > { %v1469_v53 = vadd.f32 %v2691_v42, %v1468_v52  ;;  %v1532_v56 = vmax.f32 %v1466_v51, 0.0 }
 0x3ae   : > { %v1535_v55 = vmax.f32 %v1477_v38, 0.0 }
 0x3af   : > { %v1533_v57 = vmax.f32 %v1469_v53, 0.0 }
 0x3b0   : > { %v1555_v59 = vpack.c.bf16 %v1535_v55, %v1534_v54 }
 0x3b1   : > { %v1554_v60 = vpack.c.bf16 %v1533_v57, %v1532_v56  ;;  %v2235_v61 = vpop.f32.mrb[72].mxu1 }
 0x3b2   : > { %v1490_v62 = vadd.f32 %v2235_v61, %v2691_v42  ;;  %v1481_v63 = vpop.f32.mrb[73].mxu1 }
 0x3b3   : > { %v1482_v1 = vadd.f32 %v2691_v42, %v1481_v63  ;;  %v2236_v2 = vpop.f32.mrb[74].mxu1  ;;  %2277 = vmatprep.mubr.bf16.mxu0 %v1554_v60 }
 0x3b4   : > { %v1493_v3 = vadd.f32 %v2236_v2, %v2691_v42  ;;  %v1484_v4 = vpop.f32.mrb[75].mxu1  ;;  %2278 = vmatmul.mubr.bf16.gmra.mrb[68].mxu0 %v1555_v59  ;;  %v1538_v6 = vmax.f32 %v1490_v62, 0.0 }
 0x3b5   : > { %v1485_v5 = vadd.f32 %v2691_v42, %v1484_v4  ;;  %v1536_v8 = vmax.f32 %v1482_v1, 0.0 }
 0x3b6   : > { %v1539_v7 = vmax.f32 %v1493_v3, 0.0 }
 0x3b7   : > { %v1537_v9 = vmax.f32 %v1485_v5, 0.0 }
 0x3b8   : > { %v1557_v10 = vpack.c.bf16 %v1539_v7, %v1538_v6 }
 0x3b9   : > { %v1556_v11 = vpack.c.bf16 %v1537_v9, %v1536_v8  ;;  %v2239_v12 = vpop.f32.mrb[76].mxu1 }
 0x3ba   : > { %v1506_v13 = vadd.f32 %v2239_v12, %v2691_v42  ;;  %v1497_v14 = vpop.f32.mrb[77].mxu1 }
 0x3bb   : > { %v1498_v15 = vadd.f32 %v2691_v42, %v1497_v14  ;;  %v2240_v16 = vpop.f32.mrb[78].mxu1  ;;  %2281 = vmatprep.mubr.bf16.mxu0 %v1556_v11 }
 0x3bc   : > { %v1509_v17 = vadd.f32 %v2240_v16, %v2691_v42  ;;  %v1500_v18 = vpop.f32.mrb[79].mxu1  ;;  %2282 = vmatmul.mubr.bf16.gmra.mrb[72].mxu0 %v1557_v10  ;;  %v1542_v20 = vmax.f32 %v1506_v13, 0.0 }
 0x3bd   : > { %v1501_v19 = vadd.f32 %v2691_v42, %v1500_v18  ;;  %v1540_v22 = vmax.f32 %v1498_v15, 0.0 }
 0x3be   : > { %v1543_v21 = vmax.f32 %v1509_v17, 0.0 }
 0x3bf   : > { %v1541_v23 = vmax.f32 %v1501_v19, 0.0 }
 0x3c0   : > { %v1559_v24 = vpack.c.bf16 %v1543_v21, %v1542_v20 }
 0x3c1   : > { %v1558_v25 = vpack.c.bf16 %v1541_v23, %v1540_v22 }
 0x3c3   : > { %2285 = vmatprep.mubr.bf16.mxu0 %v1558_v25 }
 0x3c4   : > { %2286 = vmatmul.mubr.bf16.gmra.mrb[76].mxu0 %v1559_v24 }
 0x45f   : > { %v2259_v42 = vpop.f32.mrb[48].mxu0 }
 0x460   : > { %v1674_v27 = vadd.f32 %v2259_v42, %v2728_v26  ;;  %v1665_v28 = vpop.f32.mrb[49].mxu0 }
 0x461   : > { %v1666_v29 = vadd.f32 %v2728_v26, %v1665_v28  ;;  %v2260_v30 = vpop.f32.mrb[50].mxu0 }
 0x462   : > { %1795 = vst.msk [vmem:[%s2735_s23 + $0x10] sm:$0xff] %vm1792_vm1, %v1674_v27  ;;  %v1677_v31 = vadd.f32 %v2260_v30, %v2728_v26  ;;  %v1668_v32 = vpop.f32.mrb[51].mxu0 }
 0x463   : > { %1793 = vst.msk [vmem:[%s2735_s23] sm:$0xff] %vm1792_vm1, %v1666_v29  ;;  %v1669_v33 = vadd.f32 %v2728_v26, %v1668_v32 }
 0x464   : > { %1796 = vst.msk [vmem:[%s2735_s23 + $0x18] sm:$0xff] %vm1792_vm1, %v1677_v31 }
 0x465   : > { %1794 = vst.msk [vmem:[%s2735_s23 + $0x8] sm:$0xff] %vm1792_vm1, %v1669_v33 }
 0x467   : > { %v2263_v34 = vpop.f32.mrb[52].mxu0 }
 0x468   : > { %v1690_v36 = vadd.f32 %v2263_v34, %v2728_v26  ;;  %v1681_v37 = vpop.f32.mrb[53].mxu0 }
 0x469   : > { %v1682_v39 = vadd.f32 %v2728_v26, %v1681_v37  ;;  %v2264_v40 = vpop.f32.mrb[54].mxu0 }
 0x46a   : > { %1799 = vst.msk [vmem:[%s2735_s23 + $0x30] sm:$0xff] %vm1792_vm1, %v1690_v36  ;;  %v1693_v41 = vadd.f32 %v2264_v40, %v2728_v26  ;;  %v1684_v35 = vpop.f32.mrb[55].mxu0 }
 0x46b   : > { %1797 = vst.msk [vmem:[%s2735_s23 + $0x20] sm:$0xff] %vm1792_vm1, %v1682_v39  ;;  %v1685_v43 = vadd.f32 %v2728_v26, %v1684_v35 }
 0x46c   : > { %1800 = vst.msk [vmem:[%s2735_s23 + $0x38] sm:$0xff] %vm1792_vm1, %v1693_v41 }
 0x46d   : > { %1798 = vst.msk [vmem:[%s2735_s23 + $0x28] sm:$0xff] %vm1792_vm1, %v1685_v43 }
 0x46f   : > { %v2267_v44 = vpop.f32.mrb[56].mxu0 }
 0x470   : > { %v1706_v45 = vadd.f32 %v2267_v44, %v2728_v26  ;;  %v1697_v46 = vpop.f32.mrb[57].mxu0 }
 0x471   : > { %v1698_v47 = vadd.f32 %v2728_v26, %v1697_v46  ;;  %v2268_v48 = vpop.f32.mrb[58].mxu0 }
 0x472   : > { %1803 = vst.msk [vmem:[%s2735_s23 + $0x50] sm:$0xff] %vm1792_vm1, %v1706_v45  ;;  %v1709_v58 = vadd.f32 %v2268_v48, %v2728_v26  ;;  %v1700_v49 = vpop.f32.mrb[59].mxu0 }
 0x473   : > { %1801 = vst.msk [vmem:[%s2735_s23 + $0x40] sm:$0xff] %vm1792_vm1, %v1698_v47  ;;  %v1701_v50 = vadd.f32 %v2728_v26, %v1700_v49 }
 0x474   : > { %1804 = vst.msk [vmem:[%s2735_s23 + $0x58] sm:$0xff] %vm1792_vm1, %v1709_v58 }
 0x475   : > { %1802 = vst.msk [vmem:[%s2735_s23 + $0x48] sm:$0xff] %vm1792_vm1, %v1701_v50 }
 0x477   : > { %v2271_v51 = vpop.f32.mrb[60].mxu0 }
 0x478   : > { %v1722_v0 = vadd.f32 %v2271_v51, %v2728_v26  ;;  %v1713_v38 = vpop.f32.mrb[61].mxu0 }
 0x479   : > { %v1714_v52 = vadd.f32 %v2728_v26, %v1713_v38  ;;  %v2272_v53 = vpop.f32.mrb[62].mxu0 }
 0x47a   : > { %1807 = vst.msk [vmem:[%s2735_s23 + $0x70] sm:$0xff] %vm1792_vm1, %v1722_v0  ;;  %v1725_v54 = vadd.f32 %v2272_v53, %v2728_v26  ;;  %v1716_v55 = vpop.f32.mrb[63].mxu0 }
 0x47b   : > { %1805 = vst.msk [vmem:[%s2735_s23 + $0x60] sm:$0xff] %vm1792_vm1, %v1714_v52  ;;  %v1717_v56 = vadd.f32 %v2728_v26, %v1716_v55 }
 0x47c   : > { %1808 = vst.msk [vmem:[%s2735_s23 + $0x78] sm:$0xff] %vm1792_vm1, %v1725_v54 }
 0x47d   : > { %1806 = vst.msk [vmem:[%s2735_s23 + $0x68] sm:$0xff] %vm1792_vm1, %v1717_v56 }
 0x47f   : > { %v2275_v57 = vpop.f32.mrb[64].mxu0 }
 0x480   : > { %v1738_v59 = vadd.f32 %v2275_v57, %v2728_v26  ;;  %v1729_v60 = vpop.f32.mrb[65].mxu0 }
 0x481   : > { %v1730_v61 = vadd.f32 %v2728_v26, %v1729_v60  ;;  %v2276_v62 = vpop.f32.mrb[66].mxu0 }
 0x482   : > { %1811 = vst.msk [vmem:[%s2735_s23 + $0x90] sm:$0xff] %vm1792_vm1, %v1738_v59  ;;  %v1741_v63 = vadd.f32 %v2276_v62, %v2728_v26  ;;  %v1732_v1 = vpop.f32.mrb[67].mxu0 }
 0x483   : > { %1809 = vst.msk [vmem:[%s2735_s23 + $0x80] sm:$0xff] %vm1792_vm1, %v1730_v61  ;;  %v1733_v2 = vadd.f32 %v2728_v26, %v1732_v1 }
 0x484   : > { %1812 = vst.msk [vmem:[%s2735_s23 + $0x98] sm:$0xff] %vm1792_vm1, %v1741_v63 }
 0x485   : > { %1810 = vst.msk [vmem:[%s2735_s23 + $0x88] sm:$0xff] %vm1792_vm1, %v1733_v2 }
 0x487   : > { %v2279_v3 = vpop.f32.mrb[68].mxu0 }
 0x488   : > { %v1754_v4 = vadd.f32 %v2279_v3, %v2728_v26  ;;  %v1745_v5 = vpop.f32.mrb[69].mxu0 }
 0x489   : > { %v1746_v6 = vadd.f32 %v2728_v26, %v1745_v5  ;;  %v2280_v7 = vpop.f32.mrb[70].mxu0 }
 0x48a   : > { %1815 = vst.msk [vmem:[%s2735_s23 + $0xb0] sm:$0xff] %vm1792_vm1, %v1754_v4  ;;  %v1757_v8 = vadd.f32 %v2280_v7, %v2728_v26  ;;  %v1748_v9 = vpop.f32.mrb[71].mxu0 }
 0x48b   : > { %1813 = vst.msk [vmem:[%s2735_s23 + $0xa0] sm:$0xff] %vm1792_vm1, %v1746_v6  ;;  %v1749_v10 = vadd.f32 %v2728_v26, %v1748_v9 }
 0x48c   : > { %1816 = vst.msk [vmem:[%s2735_s23 + $0xb8] sm:$0xff] %vm1792_vm1, %v1757_v8 }
 0x48d   : > { %1814 = vst.msk [vmem:[%s2735_s23 + $0xa8] sm:$0xff] %vm1792_vm1, %v1749_v10 }
 0x48f   : > { %v2283_v11 = vpop.f32.mrb[72].mxu0 }
 0x490   : > { %v1770_v12 = vadd.f32 %v2283_v11, %v2728_v26  ;;  %v1761_v13 = vpop.f32.mrb[73].mxu0 }
 0x491   : > { %v1762_v14 = vadd.f32 %v2728_v26, %v1761_v13  ;;  %v2284_v15 = vpop.f32.mrb[74].mxu0 }
 0x492   : > { %1819 = vst.msk [vmem:[%s2735_s23 + $0xd0] sm:$0xff] %vm1792_vm1, %v1770_v12  ;;  %v1773_v16 = vadd.f32 %v2284_v15, %v2728_v26  ;;  %v1764_v17 = vpop.f32.mrb[75].mxu0 }
 0x493   : > { %1817 = vst.msk [vmem:[%s2735_s23 + $0xc0] sm:$0xff] %vm1792_vm1, %v1762_v14  ;;  %v1765_v18 = vadd.f32 %v2728_v26, %v1764_v17 }
 0x494   : > { %1820 = vst.msk [vmem:[%s2735_s23 + $0xd8] sm:$0xff] %vm1792_vm1, %v1773_v16 }
 0x495   : > { %1818 = vst.msk [vmem:[%s2735_s23 + $0xc8] sm:$0xff] %vm1792_vm1, %v1765_v18 }
 0x497   : > { %v2287_v19 = vpop.f32.mrb[76].mxu0 }
 0x498   : > { %v1786_v20 = vadd.f32 %v2287_v19, %v2728_v26  ;;  %v1777_v21 = vpop.f32.mrb[77].mxu0 }
 0x499   : > { %v1778_v22 = vadd.f32 %v2728_v26, %v1777_v21  ;;  %v2288_v23 = vpop.f32.mrb[78].mxu0 }
 0x49a   : > { %1823 = vst.msk [vmem:[%s2735_s23 + $0xf0] sm:$0xff] %vm1792_vm1, %v1786_v20  ;;  %v1789_v24 = vadd.f32 %v2288_v23, %v2728_v26  ;;  %v1780_v25 = vpop.f32.mrb[79].mxu0 }
 0x49b   : > { %1821 = vst.msk [vmem:[%s2735_s23 + $0xe0] sm:$0xff] %vm1792_vm1, %v1778_v22  ;;  %v1781_v42 = vadd.f32 %v2728_v26, %v1780_v25 }
 0x49c   : > { %1824 = vst.msk [vmem:[%s2735_s23 + $0xf8] sm:$0xff] %vm1792_vm1, %v1789_v24 }
 0x49d   : > { %1822 = vst.msk [vmem:[%s2735_s23 + $0xe8] sm:$0xff] %vm1792_vm1, %v1781_v42 }
 0x49e PF: > { %s21_s17 = sadd.s32 1, %s2341_s17  }
 0x49f   : > { %p18_p4 = scmp.ge.s32.totalorder %s21_s17, 4  }
 0x4a1   :  { %20 = sbr.rel (!%p18_p4) target bundleno = 1 (0x1), region = 94 }

</bundles_post_ra>
